<compile_context>
chip_gen: v6e
topology: v6e:2x2x1
jax: 0.10.0
libtpu: 0.0.40
codegen_flags: <defaults>
</compile_context>

<pallas_src>
import functools

import jax
import jax.numpy as jnp
from jax.experimental import pallas as pl
from jax.experimental.pallas import tpu as pltpu


def _round_up(x: int, m: int) -> int:
    return ((x + m - 1) // m) * m


def _cdiv(a: int, b: int) -> int:
    return (a + b - 1) // b


def _balanced_tile(dim: int, max_tile: int, align: int):
    """Tile <= max_tile, multiple of `align`, with balanced blocks.

    Returns (tile, padded_dim, n_blocks) where padded_dim = tile * n_blocks and
    the total padding is at most ~one alignment unit per block (avoids the
    pathological waste of a naive min(tile, round_up(dim, align)) clamp).
    """
    dim_a = _round_up(max(dim, 1), align)
    n_blocks = max(1, _cdiv(dim_a, max_tile))
    tile = _round_up(_cdiv(dim_a, n_blocks), align)
    return tile, tile * n_blocks, n_blocks


def _tpu_vmem_capacity_bytes() -> int:
    """Physical VMEM per core; conservative (v7x = 64 MiB) fallback."""
    try:
        return int(pltpu.get_tpu_info().vmem_capacity_bytes)
    except Exception:
        return 64 * 1024 * 1024


def _hw_config():
    cap = _tpu_vmem_capacity_bytes()
    if cap >= 100 * (1 << 20):
        # v5e / v6e: 128 MiB physical VMEM -> go big, raise the scoped limit.
        return dict(tm_max=512, tn_max=2048, tk_max=2048,
                    vmem_limit=96 * (1 << 20))
    # v7x: 64 MiB physical VMEM -> cap tk, keep scoped limit well below 64 MiB.
    return dict(tm_max=512, tn_max=2048, tk_max=1024,
                vmem_limit=44 * (1 << 20))


def _linear_kernel(x_ref, w_ref, o_ref, acc_ref):
    """One (tm, tn) output tile; grid axis 2 is the K reduction."""
    k = pl.program_id(2)
    part = jnp.dot(x_ref[...], w_ref[...], preferred_element_type=jnp.float32)

    @pl.when(k == 0)
    def _():
        acc_ref[...] = part          # first k-step: write, no zero-init pass

    @pl.when(k > 0)
    def _():
        acc_ref[...] += part

    @pl.when(k == pl.num_programs(2) - 1)
    def _():
        o_ref[...] = acc_ref[...].astype(o_ref.dtype)


@functools.partial(
    jax.jit,
    static_argnames=("N", "tm_max", "tn", "tk", "vmem_limit",
                     "out_dtype", "compute_dtype"),
)
def _linear_forward(
    x,
    w_kn_padded,
    *,
    N: int,
    tm_max: int,
    tn: int,
    tk: int,
    vmem_limit: int,
    out_dtype=None,
    compute_dtype=jnp.bfloat16,
):
    """y = x @ W_kn   (F.linear semantics, no bias, tp_size == 1).

    x:           (M, input_size)
    w_kn_padded: (Kp, Np) pre-transposed, pre-cast, tile-aligned RHS
    returns      (M, N), dtype == out_dtype (defaults to x.dtype)
    """
    M, K = x.shape
    Kp, Np = w_kn_padded.shape
    assert K <= Kp and N <= Np, "weight padding inconsistent with input"
    assert Np % tn == 0 and Kp % tk == 0
    out_dtype = out_dtype or x.dtype

    # Shape-aware M tile: decode (M <= tm_max) -> single 16-aligned block so
    # the weight is streamed exactly once; prefill -> balanced 16-aligned tiles.
    tm, Mp, _ = _balanced_tile(M, tm_max, 16)

    # Only x is touched per call: cast + pad M (and the small K remainder).
    x_c = x.astype(compute_dtype)
    if (Mp, Kp) != (M, K):
        x_c = jnp.pad(x_c, ((0, Mp - M), (0, Kp - K)))
    w_c = (w_kn_padded if w_kn_padded.dtype == compute_dtype
           else w_kn_padded.astype(compute_dtype))

    grid = (Np // tn, Mp // tm, Kp // tk)   # j (N) leading parallel axis

    cbytes = jnp.dtype(compute_dtype).itemsize
    obytes = jnp.dtype(out_dtype).itemsize

    def _buf_bytes(w_bufs):
        return (tm * tk * cbytes * 2          # x double-buffer
                + tk * tn * cbytes * w_bufs   # weight buffers
                + tm * tn * obytes * 2        # output double-buffer
                + tm * tn * 4)                # f32 accumulator

    # Deeper weight pipelining when the VMEM budget allows and the grid is
    # long enough for it to matter.
    total_steps = grid[0] * grid[1] * grid[2]
    use_buffered3 = (total_steps >= 4
                     and _buf_bytes(3) <= int(0.85 * vmem_limit))
    w_spec = pl.BlockSpec((tk, tn), lambda j, i, k: (k, j))
    if use_buffered3:
        try:
            w_spec = pl.BlockSpec((tk, tn), lambda j, i, k: (k, j),
                                  pipeline_mode=pl.Buffered(3))
        except TypeError:
            pass  # older signature: fall back to default double-buffering

    cost = pl.CostEstimate(
        flops=2 * Mp * Np * Kp,
        transcendentals=0,
        bytes_accessed=(Mp * Kp + Kp * Np) * cbytes + Mp * Np * obytes,
    )

    out = pl.pallas_call(
        _linear_kernel,
        out_shape=jax.ShapeDtypeStruct((Mp, Np), out_dtype),
        grid_spec=pltpu.PrefetchScalarGridSpec(
            num_scalar_prefetch=0,
            grid=grid,
            in_specs=[
                pl.BlockSpec((tm, tk), lambda j, i, k: (i, k)),
                w_spec,
            ],
            out_specs=pl.BlockSpec((tm, tn), lambda j, i, k: (i, j)),
            scratch_shapes=[pltpu.VMEM((tm, tn), jnp.float32)],
        ),
        compiler_params=pltpu.CompilerParams(
            dimension_semantics=("parallel", "parallel", "arbitrary"),
            vmem_limit_bytes=vmem_limit,
        ),
        cost_estimate=cost,
    )(x_c, w_c)

    if (Mp, Np) != (M, N):
        out = out[:M, :N]
    return out


class LinearBase:
    """JAX/Pallas mirror of nanovllm LinearBase (tp_size == 1, no bias)."""

    def __init__(
        self,
        input_size: int,
        output_size: int,
        tp_dim=None,
        param_dtype=jnp.bfloat16,
    ):
        self.input_size = input_size
        self.output_size = output_size
        self.tp_dim = tp_dim
        self.tp_rank = 0
        self.tp_size = 1

        cfg = _hw_config()
        self._tm_max = cfg["tm_max"]
        self._vmem_limit = cfg["vmem_limit"]
        # N / K tiles depend only on layer shape + chip generation: pick once.
        self._tn, self._Np, _ = _balanced_tile(output_size, cfg["tn_max"], 128)
        self._tk, self._Kp, _ = _balanced_tile(input_size, cfg["tk_max"], 128)

        # Deterministic synthetic weight, PyTorch layout (out, in), f32.
        key = jax.random.PRNGKey(0)
        w = (
            jax.random.normal(key, (output_size, input_size), jnp.float32)
            / jnp.sqrt(jnp.float32(input_size))
        )
        self.weight = w  # reference / PyTorch-compatible layout

        # Pre-transpose + pre-cast + pre-pad ONCE at init: lane-dense,
        # tile-aligned (Kp, Np) operand consumed directly by the kernel.
        w_kn = jnp.asarray(w.T, dtype=param_dtype)
        if (self._Kp, self._Np) != (input_size, output_size):
            w_kn = jnp.pad(
                w_kn,
                ((0, self._Kp - input_size), (0, self._Np - output_size)),
            )
        self.weight_kn = jax.block_until_ready(w_kn)

    # TODO(synk): base-class forward() raises NotImplementedError in PyTorch;
    # we expose the canonical F.linear(x, weight) path its subclasses use.
    def forward(self, x):
        return _linear_forward(
            x,
            self.weight_kn,
            N=self.output_size,
            tm_max=self._tm_max,
            tn=self._tn,
            tk=self._tk,
            vmem_limit=self._vmem_limit,
            out_dtype=x.dtype,
        )

    __call__ = forward


if __name__ == "__main__":
    seq, hidden, out = 8, 32, 64
    layer = LinearBase(input_size=hidden, output_size=out)

    key = jax.random.PRNGKey(0)
    x = jax.random.normal(jax.random.fold_in(key, 1), (seq, hidden), jnp.float32)

    y = layer(x)
    y = jax.block_until_ready(y)

    # Reference check against plain JAX (F.linear semantics).  bf16 compute
    # with f32 accumulation => loose tolerances vs. the f32 reference.
    y_ref = x @ layer.weight.T
    assert y.shape == (seq, out)
    assert jnp.allclose(y, y_ref, atol=3e-2, rtol=3e-2), (
        float(jnp.max(jnp.abs(y - y_ref)))
    )

    print("KERNEL_OK")
</pallas_src>

<mosaic_0001>
module attributes {stable_mosaic.version = 11 : i64} {
  func.func @_linear_kernel(%arg0: i32, %arg1: i32, %arg2: i32, %arg3: memref<16x128xbf16, #tpu.memory_space<vmem>>, %arg4: memref<128x128xbf16, #tpu.memory_space<vmem>>, %arg5: memref<16x128xf32, #tpu.memory_space<vmem>>, %arg6: memref<16x128xf32, #tpu.memory_space<vmem>>) attributes {dimension_semantics = [#tpu.dimension_semantics<parallel>, #tpu.dimension_semantics<parallel>, #tpu.dimension_semantics<arbitrary>], iteration_bounds = array<i64: 1, 1, 1>, scalar_prefetch = 0 : i64, scratch_operands = 1 : i64, tpu.core_type = #tpu.core_type<tc>, window_params = [{transform_indices = @transform_0, window_bounds = array<i64: 16, 128>}, {transform_indices = @transform_1, window_bounds = array<i64: 128, 128>}, {transform_indices = @transform_2, window_bounds = array<i64: 16, 128>}]} {
    %c0 = arith.constant 0 : index
    %c0_0 = arith.constant 0 : index
    %0 = vector.load %arg3[%c0, %c0_0] : memref<16x128xbf16, #tpu.memory_space<vmem>>, vector<16x128xbf16>
    %c0_1 = arith.constant 0 : index
    %c0_2 = arith.constant 0 : index
    %1 = vector.load %arg4[%c0_1, %c0_2] : memref<128x128xbf16, #tpu.memory_space<vmem>>, vector<128x128xbf16>
    %cst = arith.constant dense<0.000000e+00> : vector<16x128xf32>
    %2 = tpu.matmul %0, %1, %cst {dimension_numbers = #tpu.dot_dimension_numbers<[1], [0], [0], [1], [0, 0, 1, 1], [], []>} : vector<16x128xbf16>, vector<128x128xbf16>, vector<16x128xf32> -> vector<16x128xf32>
    %c0_i32 = arith.constant 0 : i32
    %3 = arith.cmpi eq, %arg2, %c0_i32 : i32
    %4 = arith.extui %3 : i1 to i32
    %c0_i32_3 = arith.constant 0 : i32
    %5 = arith.cmpi ne, %4, %c0_i32_3 : i32
    scf.if %5 {
      %c0_8 = arith.constant 0 : index
      %c0_9 = arith.constant 0 : index
      %12 = vector.load %arg6[%c0_8, %c0_9] : memref<16x128xf32, #tpu.memory_space<vmem>>, vector<16x128xf32>
      tpu.vector_store %arg6[%c0_8, %c0_9], %2 {strides = array<i32>} : memref<16x128xf32, #tpu.memory_space<vmem>>, vector<16x128xf32>,
    } else {
    }
    %c0_i32_4 = arith.constant 0 : i32
    %6 = arith.cmpi sgt, %arg2, %c0_i32_4 : i32
    %7 = arith.extui %6 : i1 to i32
    %c0_i32_5 = arith.constant 0 : i32
    %8 = arith.cmpi ne, %7, %c0_i32_5 : i32
    scf.if %8 {
      %c0_8 = arith.constant 0 : index
      %c0_9 = arith.constant 0 : index
      %12 = vector.load %arg6[%c0_8, %c0_9] : memref<16x128xf32, #tpu.memory_space<vmem>>, vector<16x128xf32>
      %13 = arith.addf %12, %2 : vector<16x128xf32>
      %c0_10 = arith.constant 0 : index
      %c0_11 = arith.constant 0 : index
      %14 = vector.load %arg6[%c0_10, %c0_11] : memref<16x128xf32, #tpu.memory_space<vmem>>, vector<16x128xf32>
      tpu.vector_store %arg6[%c0_10, %c0_11], %13 {strides = array<i32>} : memref<16x128xf32, #tpu.memory_space<vmem>>, vector<16x128xf32>,
    } else {
    }
    %c0_i32_6 = arith.constant 0 : i32
    %9 = arith.cmpi eq, %arg2, %c0_i32_6 : i32
    %10 = arith.extui %9 : i1 to i32
    %c0_i32_7 = arith.constant 0 : i32
    %11 = arith.cmpi ne, %10, %c0_i32_7 : i32
    scf.if %11 {
      %c0_8 = arith.constant 0 : index
      %c0_9 = arith.constant 0 : index
      %12 = vector.load %arg6[%c0_8, %c0_9] : memref<16x128xf32, #tpu.memory_space<vmem>>, vector<16x128xf32>
      %c0_10 = arith.constant 0 : index
      %c0_11 = arith.constant 0 : index
      %13 = vector.load %arg5[%c0_10, %c0_11] : memref<16x128xf32, #tpu.memory_space<vmem>>, vector<16x128xf32>
      tpu.vector_store %arg5[%c0_10, %c0_11], %12 {strides = array<i32>} : memref<16x128xf32, #tpu.memory_space<vmem>>, vector<16x128xf32>,
    } else {
    }
    return
  }
  func.func @transform_0(%arg0: i32, %arg1: i32, %arg2: i32) -> (i32, i32) {
    %c0_i32 = arith.constant 0 : i32
    return %arg1, %arg2 : i32, i32
  }
  func.func @transform_1(%arg0: i32, %arg1: i32, %arg2: i32) -> (i32, i32) {
    %c0_i32 = arith.constant 0 : i32
    return %arg2, %arg0 : i32, i32
  }
  func.func @transform_2(%arg0: i32, %arg1: i32, %arg2: i32) -> (i32, i32) {
    %c0_i32 = arith.constant 0 : i32
    return %arg1, %arg0 : i32, i32
  }
}

</mosaic_0001>

<bundles_post_ra>
// kernel: _linear_forward.1
= control target key start
LH: loop header
LB: loop body
LE: loop exit
PB: predicated region body
PF: predicated region fallthrough
CT: control target
= control target key end

     0   :  { %7 = vsyncpa [#allocation4], 0  ;;  %s241_s9 = smov [#allocation3]   ;;  %s273_s0 = inlined_call_operand.vmem [shape: bf16[16,128], index: 0, kind: input, shape index: {}]   ;;  %s274_s1 = inlined_call_operand.hbm [shape: bf16[128,128], index: 1, kind: input, shape index: {}]   ;;  %s275_s2 = inlined_call_operand.vmem [shape: f32[16,128], index: 2, kind: output, shape index: {}]  }
   0x1   :  { %s15_s10 = sshll.u32 %s241_s9, 4  ;;  %s16_s10 = int_to_ptr.vmem [resolvable:$true] %s15_s10 }
   0x2   :  { %s227_s11 = scalar_lea.vmem %s16_s10, 1024  ;;  %p232_p1 = scmp.lt.s32.totalorder %s16_s10, %s16_s10 }
   0x3   :  { %p228_p0 = scmp.ne.s32.totalorder %s16_s10, %s227_s11  ;;  %p233_p2 = scmp.lt.s32.totalorder %s227_s11, %s227_s11 }
   0x5   :  { %p234_p3 = por %p233_p2, %p232_p1 }
   0x7   :  { %p235_p4 = pnand %p234_p3, %p228_p0 }
   0x9   :  { %238 = shalt.err (!%p235_p4)
}
   0xa   :  { %s242_s12 = smov 64   ;;  %s243_s13 = smov 4  }
   0xb   :  { %21 = dma.hbm_to_vmem [thread:$0]  %s274_s1, 1024, %s16_s10, [#allocation4], %s242_s12, %s242_s12, %s243_s13  }
   0xc   :  { %239 = dma.done.wait [#allocation4], 1024  }
   0xd   :  { %240 = vsyncadd [#allocation4], 4294966272  ;;  %v244_v0 = vmov 0.0   ;;  %vm245_vm0 = vmmov 0   ;;  %v210_v1 = vld [vmem:[#allocation3 + $0x38] sm:$0xff]   ;;  %v211_v2 = vld [vmem:[#allocation3 + $0x30] sm:$0xff]  }
   0xe   :  { %185 = vmatprep.subr.bf16.mxu0 %v244_v0  ;;  %201 = vmatprep.mubr.msk.bf16.mxu0 %vm245_vm0, %v244_v0  ;;  %v212_v3 = vld [vmem:[#allocation3 + $0x28] sm:$0xff]   ;;  %v213_v4 = vld [vmem:[#allocation3 + $0x20] sm:$0xff]   ;;  %v214_v5 = vld [vmem:[#allocation3 + $0x18] sm:$0xff]  }
   0xf   :  { %186 = vmatpush3.bf16.msra.mxu0 %v210_v1  ;;  %v215_v6 = vld [vmem:[#allocation3 + $0x10] sm:$0xff]   ;;  %v216_v7 = vld [vmem:[#allocation3 + $0x8] sm:$0xff]   ;;  %v217_v8 = vld [vmem:[#allocation3] sm:$0xff]  }
  0x10   :  { %187 = vmatprep.subr.bf16.mxu0 %v244_v0  ;;  %v218_v9 = vld [vmem:[%s273_s0] sm:$0xff]  }
  0x13   :  { %188 = vmatpush3.bf16.msra.mxu0 %v211_v2 }
  0x14   :  { %189 = vmatprep.subr.bf16.mxu0 %v244_v0 }
  0x17   :  { %190 = vmatpush3.bf16.msra.mxu0 %v212_v3 }
  0x18   :  { %191 = vmatprep.subr.bf16.mxu0 %v244_v0 }
  0x1b   :  { %192 = vmatpush3.bf16.msra.mxu0 %v213_v4 }
  0x1c   :  { %193 = vmatprep.subr.bf16.mxu0 %v244_v0 }
  0x1f   :  { %194 = vmatpush3.bf16.msra.mxu0 %v214_v5 }
  0x20   :  { %195 = vmatprep.subr.bf16.mxu0 %v244_v0 }
  0x23   :  { %196 = vmatpush3.bf16.msra.mxu0 %v215_v6 }
  0x24   :  { %197 = vmatprep.subr.bf16.mxu0 %v244_v0 }
  0x27   :  { %198 = vmatpush3.bf16.msra.mxu0 %v216_v7 }
  0x28   :  { %199 = vmatprep.subr.bf16.mxu0 %v244_v0 }
  0x2b   :  { %200 = vmatpush3.bf16.msra.mxu0 %v217_v8 }
  0x2e   :  { %202 = vmatmul.mubr.bf16.vlgmr.msra.gmra.mxu0 %v218_v9 }
  0xee   :  { %v132_v10 = vpop.f32.mrf.mxu0 }
  0xef   :  { %160 = vst [vmem:[%s275_s2] sm:$0xff] %v132_v10 }
  0xf0   :  { %v203_v11 = vpop.f32.mrf.mxu0 }
  0xf2   :  { %v135_v12 = vpop.f32.mrf.mxu0 }
  0xf3   :  { %161 = vst [vmem:[%s275_s2 + $0x8] sm:$0xff] %v135_v12 }
  0xf4   :  { %v204_v13 = vpop.f32.mrf.mxu0 }
  0xf5   :  { %166 = vsyncpa [#allocation4], 1 }

</bundles_post_ra>
